<compile_context>
chip_gen: v7x
topology: tpu7x:2x2x1
jax: 0.10.0
libtpu: 0.0.40
codegen_flags: <defaults>
</compile_context>

<pallas_src>
import functools
import math

import numpy as np
import jax
import jax.numpy as jnp
from jax.experimental import pallas as pl
from jax.experimental.pallas import tpu as pltpu


# ---------------------------------------------------------------------------
# Hadamard matrices (entries are +-1 -> exact in bf16)
# ---------------------------------------------------------------------------
@functools.lru_cache(maxsize=None)
def _hadamard_np(n: int) -> np.ndarray:
    assert n & (n - 1) == 0, "power-of-2 only"
    h = np.array([[1.0]], dtype=np.float32)
    while h.shape[0] < n:
        h = np.block([[h, h], [h, -h]])
    return h


@functools.lru_cache(maxsize=None)
def _packed_hadamard_np(d: int, pack: int) -> np.ndarray:
    # blockdiag(H, ..., H): applying it to `pack` concatenated per-row vectors
    # is exactly a per-row Hadamard, so packing rows needs no HBM transpose.
    return np.kron(np.eye(pack, dtype=np.float32), _hadamard_np(d))


# ---------------------------------------------------------------------------
# Generation-aware tile / VMEM budget
# ---------------------------------------------------------------------------
@functools.lru_cache(maxsize=None)
def _gen_budget():
    vmem = None
    try:
        vmem = getattr(pltpu.get_tpu_info(), "vmem_capacity_bytes", None)
    except Exception:
        vmem = None
    if vmem is None:
        vmem = 128 << 20
    if vmem <= (64 << 20):
        # v7x-class: 64 MiB VMEM per TC -> keep per-tensor blocks small.
        return {"row_target": 1 << 20, "tok_target": 1 << 20,
                "vmem_limit": 40 << 20}
    # v5e/v6e: 128 MiB physical; raise the scoped limit (v5e default is 16 MiB)
    # and use bigger tiles to amortize per-step overhead.
    return {"row_target": 2 << 20, "tok_target": 2 << 20,
            "vmem_limit": 64 << 20}


def _sublane_granule(dtype) -> int:
    # dtype-aware second-minor tiling granule: f32 -> 8, bf16 -> 16, 8-bit -> 32
    return int(max(8, 32 // np.dtype(dtype).itemsize))


def _rows_per_tile(n_rows: int, width: int, itemsize: int,
                   target_bytes: int, granule: int) -> int:
    rows = (target_bytes // max(1, width * itemsize)) // granule * granule
    rows = max(granule, rows)
    return int(n_rows if rows >= n_rows else rows)


# ---------------------------------------------------------------------------
# In-kernel fake-quant helpers (mirror QuaRot ActQuantizer math)
# ---------------------------------------------------------------------------
def _sym_scale(amax_raw, maxq, clip_ratio):
    amax = amax_raw * clip_ratio
    amax = jnp.where(amax == 0.0, 1.0, amax)
    scale = amax * (1.0 / maxq)
    return scale, pl.reciprocal(scale, approx=True)


def _asym_params(xmin_raw, xmax_raw, maxq, clip_ratio):
    xmin = jnp.minimum(xmin_raw, 0.0) * clip_ratio
    xmax = jnp.maximum(xmax_raw, 0.0) * clip_ratio
    degen = jnp.logical_and(xmin == 0.0, xmax == 0.0)
    xmin = jnp.where(degen, -1.0, xmin)
    xmax = jnp.where(degen, 1.0, xmax)
    scale = (xmax - xmin) * (1.0 / maxq)
    inv_scale = pl.reciprocal(scale, approx=True)   # full-tile multiply path
    zero = jnp.round(-xmin / scale)                 # exact recip on tiny array
    return scale, inv_scale, zero


def _quant_apply_sym(y, inv_scale, out_scale, maxq):
    q = jnp.clip(jnp.round(y * inv_scale), -(maxq + 1.0), maxq)
    return q * out_scale


def _quant_apply_asym(y, inv_scale, zero, out_scale, maxq):
    q = jnp.clip(jnp.round(y * inv_scale) + zero, 0.0, maxq)
    return (q - zero) * out_scale


def _lane_group_select(vals, y, d):
    """Build a full-width per-element parameter array from per-group (rows,1)
    values; group g owns lanes [g*d, (g+1)*d)."""
    if len(vals) == 1:
        return vals[0]
    lane = jax.lax.broadcasted_iota(jnp.int32, y.shape, y.ndim - 1)
    out = vals[-1]
    for g in range(len(vals) - 2, -1, -1):
        out = jnp.where(lane < (g + 1) * d, vals[g], out)
    return out


# ---------------------------------------------------------------------------
# Kernel 1: row path  (q always; k for no-quant / per-head quant)
#   tiles: (TR, pack*D) rows of the packed (R//pack, pack*D) view
# ---------------------------------------------------------------------------
def _row_had_kernel(h_ref, *refs, n_tensors, pack, head_dim, inv_sqrt_d,
                    quant_cfg):
    hp = h_ref[...]                                    # (pack*D, pack*D), +-1
    d = head_dim
    for t in range(n_tensors):
        x = refs[t][...]
        o_ref = refs[n_tensors + t]
        hm = hp if hp.dtype == x.dtype else hp.astype(x.dtype)
        # Single MXU pass, f32 accumulation; contraction width = pack*D.
        y = jnp.dot(x, hm, preferred_element_type=jnp.float32)

        if quant_cfg is None or t != n_tensors - 1:
            o_ref[...] = (y * inv_sqrt_d).astype(o_ref.dtype)
            continue

        # k: per-(token, head) fake quant == per D-lane group of the packed
        # row.  1/sqrt(D) is folded into the dequant scale.
        bits = quant_cfg["bits"]
        sym = quant_cfg["sym"]
        clip = quant_cfg["clip_ratio"]
        maxq = float(2 ** (bits - 1) - 1) if sym else float(2 ** bits - 1)

        inv_scales, out_scales, zeros = [], [], []
        for g in range(pack):
            yg = y[:, g * d:(g + 1) * d]
            if sym:
                amax = jnp.max(jnp.abs(yg), axis=-1, keepdims=True)
                scale, inv_scale = _sym_scale(amax, maxq, clip)
            else:
                xmin = jnp.min(yg, axis=-1, keepdims=True)
                xmax = jnp.max(yg, axis=-1, keepdims=True)
                scale, inv_scale, zero = _asym_params(xmin, xmax, maxq, clip)
                zeros.append(zero)
            inv_scales.append(inv_scale)
            out_scales.append(scale * inv_sqrt_d)

        inv_scale = _lane_group_select(inv_scales, y, d)
        out_scale = _lane_group_select(out_scales, y, d)
        if sym:
            deq = _quant_apply_sym(y, inv_scale, out_scale, maxq)
        else:
            zero = _lane_group_select(zeros, y, d)
            deq = _quant_apply_asym(y, inv_scale, zero, out_scale, maxq)
        o_ref[...] = deq.astype(o_ref.dtype)


def _call_row_path(h_mat, tensors, pack, head_dim, out_dtype, quant_last_cfg):
    n = len(tensors)
    rp, w = tensors[0].shape
    budget = _gen_budget()
    gran = max([_sublane_granule(out_dtype)] +
               [_sublane_granule(t.dtype) for t in tensors])
    itemsize = max([np.dtype(out_dtype).itemsize] +
                   [np.dtype(t.dtype).itemsize for t in tensors])
    tr = _rows_per_tile(rp, w, itemsize, budget["row_target"], gran)
    grid = (pl.cdiv(rp, tr),)

    kernel = functools.partial(
        _row_had_kernel, n_tensors=n, pack=pack, head_dim=head_dim,
        inv_sqrt_d=1.0 / math.sqrt(head_dim), quant_cfg=quant_last_cfg)
    tile_spec = pl.BlockSpec((tr, w), lambda i: (i, 0))
    h_spec = pl.BlockSpec((w, w), lambda i: (0, 0))

    return pl.pallas_call(
        kernel,
        out_shape=tuple(jax.ShapeDtypeStruct((rp, w), out_dtype)
                        for _ in range(n)),
        grid_spec=pltpu.PrefetchScalarGridSpec(
            num_scalar_prefetch=0,
            grid=grid,
            in_specs=[h_spec] + [tile_spec] * n,
            out_specs=tuple(tile_spec for _ in range(n))),
        compiler_params=pltpu.CompilerParams(
            dimension_semantics=("parallel",),
            vmem_limit_bytes=budget["vmem_limit"]),
    )(h_mat, *tensors)


# ---------------------------------------------------------------------------
# Kernel 2: token-wise K quant path (k_groupsize == -1), q fused in
#   blocks: (NH, TS, D) so a token's full hidden row lives in one block
# ---------------------------------------------------------------------------
def _token_had_quant_kernel(h_ref, q_ref, k_ref, qo_ref, ko_ref, *,
                            num_heads, head_dim, inv_sqrt_d, quant_cfg):
    nh, d = num_heads, head_dim
    h = h_ref[...]                                     # (D, D), +-1

    def rotate(x_ref):
        x = x_ref[...]                                 # (NH, TS, D)
        ts = x.shape[1]
        hm = h if h.dtype == x.dtype else h.astype(x.dtype)
        # One (NH*TS, D) x (D, D) MXU pass; leading-dim collapse is free.
        y = jnp.dot(x.reshape(nh * ts, d), hm,
                    preferred_element_type=jnp.float32)
        return y.reshape(nh, ts, d)

    # q: Hadamard only, fused into the same launch as k.
    yq = rotate(q_ref)
    qo_ref[...] = (yq * inv_sqrt_d).astype(qo_ref.dtype)

    # k: Hadamard + token-wise fake quant over hidden = NH*D, all on register
    # values (no f32 VMEM scratch round-trip, no second matmul pass).
    yk = rotate(k_ref)
    ts = yk.shape[1]
    bits = quant_cfg["bits"]
    sym = quant_cfg["sym"]
    clip = quant_cfg["clip_ratio"]
    maxq = float(2 ** (bits - 1) - 1) if sym else float(2 ** bits - 1)

    def fold_heads(r3, op):                            # (NH, TS, 1) -> (TS, 1)
        acc = r3[0]
        for hd in range(1, nh):
            acc = op(acc, r3[hd])
        return acc

    def bcast(p):                                      # (TS, 1) -> (NH, TS, 1)
        return jnp.broadcast_to(p, (nh, ts, 1))

    if sym:
        amax = fold_heads(jnp.max(jnp.abs(yk), axis=-1, keepdims=True),
                          jnp.maximum)
        scale, inv_scale = _sym_scale(amax, maxq, clip)
        out = _quant_apply_sym(yk, bcast(inv_scale),
                               bcast(scale * inv_sqrt_d), maxq)
    else:
        xmin = fold_heads(jnp.min(yk, axis=-1, keepdims=True), jnp.minimum)
        xmax = fold_heads(jnp.max(yk, axis=-1, keepdims=True), jnp.maximum)
        scale, inv_scale, zero = _asym_params(xmin, xmax, maxq, clip)
        out = _quant_apply_asym(yk, bcast(inv_scale), bcast(zero),
                                bcast(scale * inv_sqrt_d), maxq)
    ko_ref[...] = out.astype(ko_ref.dtype)


def _call_token_path(h_mat, q, k, quant_cfg, out_dtype):
    B, NH, S, D = k.shape
    budget = _gen_budget()
    gran = max(_sublane_granule(q.dtype), _sublane_granule(k.dtype),
               _sublane_granule(out_dtype))
    itemsize = max(np.dtype(q.dtype).itemsize, np.dtype(k.dtype).itemsize,
                   np.dtype(out_dtype).itemsize)
    ts = _rows_per_tile(S, NH * D, itemsize, budget["tok_target"], gran)
    grid = (B, pl.cdiv(S, ts))

    kernel = functools.partial(
        _token_had_quant_kernel, num_heads=NH, head_dim=D,
        inv_sqrt_d=1.0 / math.sqrt(D), quant_cfg=quant_cfg)
    blk = pl.BlockSpec((None, NH, ts, D), lambda b, s: (b, 0, s, 0))
    h_spec = pl.BlockSpec((D, D), lambda b, s: (0, 0))

    return pl.pallas_call(
        kernel,
        out_shape=(jax.ShapeDtypeStruct((B, NH, S, D), out_dtype),
                   jax.ShapeDtypeStruct((B, NH, S, D), out_dtype)),
        grid_spec=pltpu.PrefetchScalarGridSpec(
            num_scalar_prefetch=0,
            grid=grid,
            in_specs=[h_spec, blk, blk],
            out_specs=(blk, blk)),
        compiler_params=pltpu.CompilerParams(
            dimension_semantics=("parallel", "parallel"),
            vmem_limit_bytes=budget["vmem_limit"]),
    )(h_mat, q, k)


# ---------------------------------------------------------------------------
# Public wrapper (q, k in PyTorch layout [bsz, num_heads, seq_len, head_dim])
# ---------------------------------------------------------------------------
def qk_rotation_forward(q, k, *, num_heads, k_bits=16, k_groupsize=-1,
                        k_sym=True, k_clip_ratio=1.0):
    B, NH, S, D = q.shape
    assert NH == num_heads and k.shape == q.shape
    assert D & (D - 1) == 0, "Only power-of-2 head_dim is supported"
    assert k_groupsize in (-1, D)

    out_dtype = q.dtype
    quantize_k = k_bits < 16
    token_wise = quantize_k and (k_groupsize == -1)
    quant_cfg = (dict(bits=k_bits, sym=k_sym, clip_ratio=k_clip_ratio)
                 if quantize_k else None)

    if token_wise:
        # q and k share one launch; k's per-token (min, max) over hidden_size
        # needs all heads of a token in one (NH, TS, D) block -- no transpose.
        h_mat = jnp.asarray(_hadamard_np(D), dtype=out_dtype)
        return _call_token_path(h_mat, q, k, quant_cfg, out_dtype)

    # Row path: no-quant or per-head quant.  Pack 2 rows per block row when
    # possible (free reshape + block-diagonal Hadamard).
    R = B * NH * S
    pack = 2 if R % 2 == 0 else 1
    hp = jnp.asarray(_packed_hadamard_np(D, pack), dtype=out_dtype)
    q_rows = q.reshape(R // pack, pack * D)
    k_rows = k.reshape(R // pack, pack * D)   # no wrapper-side cast/transpose
    q_out, k_out = _call_row_path(hp, [q_rows, k_rows], pack, D, out_dtype,
                                  quant_cfg)
    return q_out.reshape(B, NH, S, D), k_out.reshape(B, NH, S, D)
    # TODO(synk): if k.dtype != q.dtype the tiny Hadamard is cast to k's dtype
    # in-kernel; the PyTorch module casts k to q.dtype only after the Hadamard,
    # which is equivalent here up to rounding of the (exact +-1) transform.


# ---------------------------------------------------------------------------
# Pure-JAX reference (mirror of the PyTorch forward), for verification
# ---------------------------------------------------------------------------
def reference_forward(q, k, *, hidden_size, k_bits, k_groupsize, k_sym,
                      k_clip_ratio):
    B, NH, S, D = q.shape
    dtype = q.dtype
    H = jnp.asarray(_hadamard_np(D), jnp.float32) / math.sqrt(D)
    q_had = jnp.matmul(q.astype(jnp.float32), H,
                       precision=jax.lax.Precision.HIGHEST).astype(dtype)
    k_had = jnp.matmul(k.astype(jnp.float32), H,
                       precision=jax.lax.Precision.HIGHEST)
    if k_bits >= 16:
        return q_had, k_had.astype(dtype)

    def fq(x):
        xmin = jnp.minimum(jnp.min(x, axis=-1, keepdims=True), 0.0) * k_clip_ratio
        xmax = jnp.maximum(jnp.max(x, axis=-1, keepdims=True), 0.0) * k_clip_ratio
        if k_sym:
            maxq = float(2 ** (k_bits - 1) - 1)
            xmax = jnp.maximum(jnp.abs(xmin), xmax)
            xmax = jnp.where(jnp.logical_and(xmin == 0.0, xmax == 0.0), 1.0, xmax)
            scale = xmax / maxq
            qv = jnp.clip(jnp.round(x / scale), -(maxq + 1.0), maxq)
            return qv * scale
        maxq = float(2 ** k_bits - 1)
        degen = jnp.logical_and(xmin == 0.0, xmax == 0.0)
        xmin = jnp.where(degen, -1.0, xmin)
        xmax = jnp.where(degen, 1.0, xmax)
        scale = (xmax - xmin) / maxq
        zero = jnp.round(-xmin / scale)
        qv = jnp.clip(jnp.round(x / scale) + zero, 0.0, maxq)
        return (qv - zero) * scale

    if k_groupsize == -1:
        rows = k_had.transpose(0, 2, 1, 3).reshape(-1, hidden_size)
        k_out = fq(rows).reshape(B, S, NH, D).transpose(0, 2, 1, 3)
    else:
        rows = k_had.reshape(-1, D)
        k_out = fq(rows).reshape(B, NH, S, D)
    return q_had, k_out.astype(dtype)


if __name__ == "__main__":
    # config: hidden_size=32, num_attention_heads=4 -> head_dim=8 (power of 2)
    B, NH, S, D = 2, 4, 8, 8
    hidden = NH * D

    key = jax.random.PRNGKey(0)
    kq, kk = jax.random.split(key)
    q = jax.random.normal(kq, (B, NH, S, D), jnp.float32)
    k = jax.random.normal(kk, (B, NH, S, D), jnp.float32)
    # Round inputs to the bf16 grid so the single default-precision MXU pass in
    # the kernel is exact and the check against the f32 reference stays tight.
    q = q.astype(jnp.bfloat16).astype(jnp.float32)
    k = k.astype(jnp.bfloat16).astype(jnp.float32)

    configs = [
        dict(k_bits=8, k_groupsize=-1, k_sym=True, k_clip_ratio=1.0),   # token sym
        dict(k_bits=4, k_groupsize=-1, k_sym=False, k_clip_ratio=0.9),  # token asym
        dict(k_bits=8, k_groupsize=D, k_sym=True, k_clip_ratio=1.0),    # per-head sym
        dict(k_bits=4, k_groupsize=D, k_sym=False, k_clip_ratio=0.9),   # per-head asym
        dict(k_bits=16, k_groupsize=D, k_sym=True, k_clip_ratio=1.0),   # quant disabled
    ]

    ok = True
    for cfg in configs:
        q_out, k_out = qk_rotation_forward(q, k, num_heads=NH, **cfg)
        jax.block_until_ready((q_out, k_out))
        q_ref, k_ref = reference_forward(q, k, hidden_size=hidden, **cfg)

        if not bool(jnp.allclose(q_out, q_ref, atol=2e-3, rtol=2e-3)):
            ok = False

        kmax = float(jnp.max(jnp.abs(k_ref)))
        if cfg["k_bits"] >= 16:
            tol = 2e-3 + 2e-3 * kmax
        elif cfg["k_sym"]:
            # allow ~one quantization bucket (approx-reciprocal round flips)
            tol = 1.4 * kmax / (2 ** (cfg["k_bits"] - 1) - 1) + 1e-3
        else:
            tol = 1.4 * 2.0 * kmax / (2 ** cfg["k_bits"] - 1) + 1e-3
        if float(jnp.max(jnp.abs(k_out - k_ref))) > tol:
            ok = False

    if ok:
        print("KERNEL_OK")
    else:
        print("KERNEL_MISMATCH")
</pallas_src>

<mosaic_0001>
module attributes {stable_mosaic.version = 11 : i64} {
  func.func @_token_had_quant_kernel(%arg0: i32, %arg1: i32, %arg2: memref<8x8xf32, #tpu.memory_space<vmem>>, %arg3: memref<1x4x8x8xf32, #tpu.memory_space<vmem>>, %arg4: memref<1x4x8x8xf32, #tpu.memory_space<vmem>>, %arg5: memref<1x4x8x8xf32, #tpu.memory_space<vmem>>, %arg6: memref<1x4x8x8xf32, #tpu.memory_space<vmem>>) attributes {dimension_semantics = [#tpu.dimension_semantics<parallel>, #tpu.dimension_semantics<parallel>], iteration_bounds = array<i64: 2, 1>, scalar_prefetch = 0 : i64, scratch_operands = 0 : i64, tpu.core_type = #tpu.core_type<tc>, window_params = [{pipeline_mode = #tpu.pipeline_mode<synchronous>, transform_indices = @transform_0, window_bounds = array<i64: 8, 8>}, {transform_indices = @transform_1, window_bounds = array<i64: 1, 4, 8, 8>}, {transform_indices = @transform_2, window_bounds = array<i64: 1, 4, 8, 8>}, {transform_indices = @transform_3, window_bounds = array<i64: 1, 4, 8, 8>}, {transform_indices = @transform_4, window_bounds = array<i64: 1, 4, 8, 8>}]} {
    %c0 = arith.constant 0 : index
    %c0_0 = arith.constant 0 : index
    %0 = vector.load %arg2[%c0, %c0_0] : memref<8x8xf32, #tpu.memory_space<vmem>>, vector<8x8xf32>
    %c0_1 = arith.constant 0 : index
    %c0_2 = arith.constant 0 : index
    %c0_3 = arith.constant 0 : index
    %c0_4 = arith.constant 0 : index
    %1 = vector.load %arg3[%c0_1, %c0_2, %c0_3, %c0_4] : memref<1x4x8x8xf32, #tpu.memory_space<vmem>>, vector<1x4x8x8xf32>
    %2 = vector.shape_cast %1 : vector<1x4x8x8xf32> to vector<4x8x8xf32>
    %3 = vector.shape_cast %2 : vector<4x8x8xf32> to vector<32x8xf32>
    %cst = arith.constant dense<0.000000e+00> : vector<32x8xf32>
    %4 = tpu.matmul %3, %0, %cst {dimension_numbers = #tpu.dot_dimension_numbers<[1], [0], [0], [1], [0, 0, 1, 1], [], []>} : vector<32x8xf32>, vector<8x8xf32>, vector<32x8xf32> -> vector<32x8xf32>
    %5 = vector.shape_cast %4 : vector<32x8xf32> to vector<4x8x8xf32>
    %cst_5 = arith.constant 0.353553385 : f32
    %6 = vector.broadcast %cst_5 : f32 to vector<4x8x8xf32>
    %7 = arith.mulf %5, %6 : vector<4x8x8xf32>
    %c0_6 = arith.constant 0 : index
    %c0_7 = arith.constant 0 : index
    %c0_8 = arith.constant 0 : index
    %c0_9 = arith.constant 0 : index
    %8 = vector.load %arg5[%c0_6, %c0_7, %c0_8, %c0_9] : memref<1x4x8x8xf32, #tpu.memory_space<vmem>>, vector<1x4x8x8xf32>
    %9 = vector.shape_cast %8 : vector<1x4x8x8xf32> to vector<4x8x8xf32>
    %10 = vector.shape_cast %7 : vector<4x8x8xf32> to vector<1x4x8x8xf32>
    tpu.vector_store %arg5[%c0_6, %c0_7, %c0_8, %c0_9], %10 {strides = array<i32>} : memref<1x4x8x8xf32, #tpu.memory_space<vmem>>, vector<1x4x8x8xf32>,
    %c0_10 = arith.constant 0 : index
    %c0_11 = arith.constant 0 : index
    %c0_12 = arith.constant 0 : index
    %c0_13 = arith.constant 0 : index
    %11 = vector.load %arg4[%c0_10, %c0_11, %c0_12, %c0_13] : memref<1x4x8x8xf32, #tpu.memory_space<vmem>>, vector<1x4x8x8xf32>
    %12 = vector.shape_cast %11 : vector<1x4x8x8xf32> to vector<4x8x8xf32>
    %13 = vector.shape_cast %12 : vector<4x8x8xf32> to vector<32x8xf32>
    %cst_14 = arith.constant dense<0.000000e+00> : vector<32x8xf32>
    %14 = tpu.matmul %13, %0, %cst_14 {dimension_numbers = #tpu.dot_dimension_numbers<[1], [0], [0], [1], [0, 0, 1, 1], [], []>} : vector<32x8xf32>, vector<8x8xf32>, vector<32x8xf32> -> vector<32x8xf32>
    %15 = vector.shape_cast %14 : vector<32x8xf32> to vector<4x8x8xf32>
    %16 = math.absf %15 : vector<4x8x8xf32>
    %cst_15 = arith.constant dense<0xFF800000> : vector<4x8xf32>
    %17 = vector.multi_reduction <maximumf>, %16, %cst_15 [2] : vector<4x8x8xf32> to vector<4x8xf32>
    %18 = vector.shape_cast %17 : vector<4x8xf32> to vector<4x8x1xf32>
    %19 = vector.extract_strided_slice %18 {offsets = [0, 0, 0], sizes = [1, 8, 1], strides = [1, 1, 1]} : vector<4x8x1xf32> to vector<1x8x1xf32>
    %20 = vector.shape_cast %19 : vector<1x8x1xf32> to vector<8x1xf32>
    %21 = vector.extract_strided_slice %18 {offsets = [1, 0, 0], sizes = [1, 8, 1], strides = [1, 1, 1]} : vector<4x8x1xf32> to vector<1x8x1xf32>
    %22 = vector.shape_cast %21 : vector<1x8x1xf32> to vector<8x1xf32>
    %23 = arith.maximumf %20, %22 : vector<8x1xf32>
    %24 = vector.extract_strided_slice %18 {offsets = [2, 0, 0], sizes = [1, 8, 1], strides = [1, 1, 1]} : vector<4x8x1xf32> to vector<1x8x1xf32>
    %25 = vector.shape_cast %24 : vector<1x8x1xf32> to vector<8x1xf32>
    %26 = arith.maximumf %23, %25 : vector<8x1xf32>
    %27 = vector.extract_strided_slice %18 {offsets = [3, 0, 0], sizes = [1, 8, 1], strides = [1, 1, 1]} : vector<4x8x1xf32> to vector<1x8x1xf32>
    %28 = vector.shape_cast %27 : vector<1x8x1xf32> to vector<8x1xf32>
    %29 = arith.maximumf %26, %28 : vector<8x1xf32>
    %cst_16 = arith.constant 1.000000e+00 : f32
    %30 = vector.broadcast %cst_16 : f32 to vector<8x1xf32>
    %31 = arith.mulf %29, %30 : vector<8x1xf32>
    %cst_17 = arith.constant 0.000000e+00 : f32
    %32 = vector.broadcast %cst_17 : f32 to vector<8x1xf32>
    %33 = arith.cmpf oeq, %31, %32 : vector<8x1xf32>
    %cst_18 = arith.constant 1.000000e+00 : f32
    %34 = vector.broadcast %cst_18 : f32 to vector<8x1xf32>
    %35 = arith.select %33, %34, %31 : vector<8x1xi1>, vector<8x1xf32>
    %cst_19 = arith.constant 0.00787401571 : f32
    %36 = vector.broadcast %cst_19 : f32 to vector<8x1xf32>
    %37 = arith.mulf %35, %36 : vector<8x1xf32>
    %38 = tpu.reciprocal %37 {approx = true} : vector<8x1xf32> -> vector<8x1xf32>
    %39 = vector.shape_cast %38 : vector<8x1xf32> to vector<1x8x1xf32>
    %40 = vector.broadcast %39 : vector<1x8x1xf32> to vector<4x8x1xf32>
    %cst_20 = arith.constant 0.353553385 : f32
    %41 = vector.broadcast %cst_20 : f32 to vector<8x1xf32>
    %42 = arith.mulf %37, %41 : vector<8x1xf32>
    %43 = vector.shape_cast %42 : vector<8x1xf32> to vector<1x8x1xf32>
    %44 = vector.broadcast %43 : vector<1x8x1xf32> to vector<4x8x1xf32>
    %45 = vector.broadcast %40 : vector<4x8x1xf32> to vector<4x8x8xf32>
    %46 = arith.mulf %15, %45 : vector<4x8x8xf32>
    %47 = math.roundeven %46 : vector<4x8x8xf32>
    %cst_21 = arith.constant -1.280000e+02 : f32
    %cst_22 = arith.constant 1.270000e+02 : f32
    %48 = vector.broadcast %cst_21 : f32 to vector<4x8x8xf32>
    %49 = arith.maximumf %48, %47 : vector<4x8x8xf32>
    %50 = vector.broadcast %cst_22 : f32 to vector<4x8x8xf32>
    %51 = arith.minimumf %50, %49 : vector<4x8x8xf32>
    %52 = vector.broadcast %44 : vector<4x8x1xf32> to vector<4x8x8xf32>
    %53 = arith.mulf %51, %52 : vector<4x8x8xf32>
    %c0_23 = arith.constant 0 : index
    %c0_24 = arith.constant 0 : index
    %c0_25 = arith.constant 0 : index
    %c0_26 = arith.constant 0 : index
    %54 = vector.load %arg6[%c0_23, %c0_24, %c0_25, %c0_26] : memref<1x4x8x8xf32, #tpu.memory_space<vmem>>, vector<1x4x8x8xf32>
    %55 = vector.shape_cast %54 : vector<1x4x8x8xf32> to vector<4x8x8xf32>
    %56 = vector.shape_cast %53 : vector<4x8x8xf32> to vector<1x4x8x8xf32>
    tpu.vector_store %arg6[%c0_23, %c0_24, %c0_25, %c0_26], %56 {strides = array<i32>} : memref<1x4x8x8xf32, #tpu.memory_space<vmem>>, vector<1x4x8x8xf32>,
    return
  }
  func.func @transform_0(%arg0: i32, %arg1: i32) -> (i32, i32) {
    %c0_i32 = arith.constant 0 : i32
    %c0_i32_0 = arith.constant 0 : i32
    %c0_i32_1 = arith.constant 0 : i32
    return %c0_i32, %c0_i32_0 : i32, i32
  }
  func.func @transform_1(%arg0: i32, %arg1: i32) -> (i32, i32, i32, i32) {
    %c0_i32 = arith.constant 0 : i32
    %c0_i32_0 = arith.constant 0 : i32
    %c0_i32_1 = arith.constant 0 : i32
    return %arg0, %c0_i32, %arg1, %c0_i32_0 : i32, i32, i32, i32
  }
  func.func @transform_2(%arg0: i32, %arg1: i32) -> (i32, i32, i32, i32) {
    %c0_i32 = arith.constant 0 : i32
    %c0_i32_0 = arith.constant 0 : i32
    %c0_i32_1 = arith.constant 0 : i32
    return %arg0, %c0_i32, %arg1, %c0_i32_0 : i32, i32, i32, i32
  }
  func.func @transform_3(%arg0: i32, %arg1: i32) -> (i32, i32, i32, i32) {
    %c0_i32 = arith.constant 0 : i32
    %c0_i32_0 = arith.constant 0 : i32
    %c0_i32_1 = arith.constant 0 : i32
    return %arg0, %c0_i32, %arg1, %c0_i32_0 : i32, i32, i32, i32
  }
  func.func @transform_4(%arg0: i32, %arg1: i32) -> (i32, i32, i32, i32) {
    %c0_i32 = arith.constant 0 : i32
    %c0_i32_0 = arith.constant 0 : i32
    %c0_i32_1 = arith.constant 0 : i32
    return %arg0, %c0_i32, %arg1, %c0_i32_0 : i32, i32, i32, i32
  }
}

</mosaic_0001>

<bundles_post_ra>
// kernel: tpu_custom_call.1
= control target key start
LH: loop header
LB: loop body
LE: loop exit
PB: predicated region body
PF: predicated region fallthrough
CT: control target
= control target key end

     0   :  { %10 = vsyncpa [#allocation3], 0  ;;  %s1495_s0 = inlined_call_operand.hbm [shape: f32[8,8], index: 0, kind: input, shape index: {}]   ;;  %s1496_s1 = inlined_call_operand.hbm [shape: f32[2,4,8,8], index: 1, kind: input, shape index: {}]   ;;  %s1497_s2 = inlined_call_operand.hbm [shape: f32[2,4,8,8], index: 2, kind: input, shape index: {}]   ;;  %s1498_s3 = inlined_call_operand.hbm [shape: f32[2,4,8,8], index: 3, kind: output, shape index: {0}]   ;;  %s1499_s4 = inlined_call_operand.hbm [shape: f32[2,4,8,8], index: 4, kind: output, shape index: {1}]  }
   0x1   :  { %11 = vsyncpa [#allocation6], 0 }
   0x2   :  { %13 = vsyncpa [#allocation6 + $0x1], 0 }
   0x3   :  { %14 = vsyncpa [#allocation4], 0 }
   0x4   :  { %16 = vsyncpa [#allocation4 + $0x1], 0 }
   0x5   :  { %17 = vsyncpa [#allocation10], 0 }
   0x6   :  { %19 = vsyncpa [#allocation10 + $0x1], 0  ;;  %s1147_s15 = smov 0   ;;  %s1149_s16 = smov 0  }
   0x7   :  { %s1151_s17 = smov 0   ;;  %s1153_s18 = smov 0  }
   0x8   :  { %s1155_s19 = smov 0   ;;  %s1157_s20 = smov 0  }
   0x9 LB: > { %s37_s21 = sadd.s32 1, %s1107_s19  ;;  %s67_s22 = sadd.s32 1, %s1099_s17  ;;  %s1111_s20 = sphi %s1157_s20, %s25_s20   ;;  %s1107_s19 = sphi %s1155_s19, %s1525_s19   ;;  %s1103_s18 = sphi %s1153_s18, %s1524_s18   ;;  %s1099_s17 = sphi %s1151_s17, %s1523_s17   ;;  %s1095_s16 = sphi %s1149_s16, %s1522_s16   ;;  %s1091_s15 = sphi %s1147_s15, %s1521_s15  }
   0xa   : > { %p39_p0 = scmp.ge.s32.totalorder %s37_s21, 2  ;;  %p74_p1 = scmp.ne.s32.totalorder %s1099_s17, %s1095_s16 }
   0xb   : > { %p75_p2 = scmp.eq.s32.totalorder %s1111_s20, 0  ;;  %p847_p5 = scmp.lt.s32.totalorder %s1111_s20, 2 }
   0xc   : > { %s1527_s21 = smov (%p39_p0, %s37_s21), 0  ;;  %s199_s24 = sand.u32 1, %s1111_s20  }
   0xd   : > { %p76_p4 = por %p75_p2, %p74_p1  ;;  %s62_s23 = ssub.s32 %s1107_s19, %s1527_s21 }
   0xe   : > { %p65_p6 = scmp.eq.s32.totalorder %s62_s23, 0  ;;  %s201_s25 = sand.u32 1, %s1099_s17  }
   0xf   : > { %s782_s26 = sshll.u32 %s1107_s19, 9  ;;  %s1197_s28 = sshll.u32 %s201_s25, 5 }
  0x10   : > { %s1195_s27 = scalar_select %p65_p6, %s1099_s17, %s67_s22  }
  0x11   : > { %s1204_s5 = scalar_lea.hbm %s1496_s1, %s782_s26  ;;  %p1206_p7 = pnand %p847_p5, %p76_p4 }
  0x12   : > { %s203_s7 = scalar_lea.vmem [#allocation5], %s1197_s28  ;;  %s1213_s9 = scalar_lea.sflag [#allocation6], %s199_s24 }
  0x13   : > { %s211_s8 = sshll.u32 %s203_s7, 4  ;;  %s905_s10 = scalar_lea.hbm %s1204_s5, 512  ;;  %s1211_s8 = int_to_ptr.vmem [resolvable:$true] %s211_s8 }
  0x14   : > { %p906_p8 = scmp.ne.s32.totalorder %s1204_s5, %s905_s10  ;;  %p907_p9 = pneg %p1206_p7 }
  0x15   : > { %s910_s13 = scalar_lea.hbm %s1496_s1, 1024  ;;  %p911_p12 = scmp.lt.u32.totalorder %s1204_s5, %s1496_s1 }
  0x16   : > { %p908_p10 = pnand %p907_p9, %p906_p8  ;;  %p912_p13 = scmp.lt.u32.totalorder %s910_s13, %s905_s10 }
  0x17   : > { %p914_p2 = scmp.lt.u32.totalorder %s905_s10, %s1204_s5 }
  0x18   : > { %p909_p11 = pneg %p908_p10  ;;  %p913_p0 = por %p912_p13, %p911_p12 }
  0x1a   : > { %p915_p4 = por %p914_p2, %p913_p0 }
  0x1c   : > { %p916_p5 = pnand %p915_p4, %p909_p11 }
  0x1e   : > { %919 = shalt.err (!%p916_p5)
}
  0x1f   : > { %s920_s23 = scalar_lea.vmem %s1211_s8, 512  ;;  %s1113_s24 = smov [#allocation5]  }
  0x20   : > { %p921_p6 = scmp.ne.s32.totalorder %s1211_s8, %s920_s23  ;;  %s925_s25 = sshll.u32 %s1113_s24, 4  ;;  %s926_s25 = int_to_ptr.vmem [resolvable:$false] %s925_s25 }
  0x21   : > { %s927_s29 = scalar_lea.vmem %s926_s25, 1024  ;;  %p928_p3 = scmp.lt.s32.totalorder %s1211_s8, %s926_s25 }
  0x22   : > { %p923_p8 = pnand %p921_p6, %p907_p9  ;;  %p929_p12 = scmp.lt.s32.totalorder %s927_s29, %s920_s23 }
  0x24   : > { %p924_p10 = pneg %p923_p8  ;;  %p930_p13 = por %p929_p12, %p928_p3 }
  0x26   : > { %p931_p0 = pnand %p930_p13, %p924_p10 }
  0x28   : > { %934 = shalt.err (!%p931_p0)
}
  0x29   : > { %s1500_s30 = smov 128   ;;  %s1115_s7 = smov 8  }
  0x2a   : > { %835 = dma.hbm_to_vmem [thread:$0]  (!%p1206_p7), %s1204_s5, 512, %s1211_s8, %s1213_s9, %s1500_s30, %s1500_s30, %s1115_s7  }
  0x2b   : > { %s1249_s12 = scalar_lea.hbm %s1497_s2, %s782_s26  ;;  %s225_s13 = scalar_lea.vmem [#allocation7], %s1197_s28 }
  0x2c   : > { %s233_s14 = sshll.u32 %s225_s13, 4  ;;  %s1253_s22 = sadd.s32 4294967295, %s1111_s20   ;;  %s1279_s14 = int_to_ptr.vmem [resolvable:$true] %s233_s14 }
  0x2d   : > { %s750_s23 = sadd.s32 4294967294, %s1111_s20   ;;  %p80_p3 = scmp.ne.s32.totalorder %s1095_s16, %s1091_s15 }
  0x2e   : > { %p1501_p11 = scmp.eq.s32.totalorder %s1253_s22, 0  ;;  %p134_p2 = scmp.eq.s32.totalorder %s1253_s22, 1 }
  0x2f   : > { %p140_p4 = scmp.eq.s32.totalorder %s750_s23, 1  ;;  %p751_p5 = scmp.ge.s32.totalorder %s1111_s20, 1 }
  0x30   : > { %p1263_p6 = por %p1501_p11, %p80_p3  ;;  %p1270_p8 = por %p134_p2, %p74_p1 }
  0x31   : > { %p1274_p10 = por %p140_p4, %p80_p3  ;;  %p175_p12 = scmp.lt.s32.totalorder %s1111_s20, 3 }
  0x32   : > { %s1506_s26 = scalar_select %p1263_p6, 1, 0 }
  0x33   : > { %s1507_s28 = scalar_select %p1270_p8, 1, 0 }
  0x34   : > { %s1508_s5 = scalar_select %p1274_p10, 1, 0 }
  0x35   : > { %p1281_p13 = pnand %p751_p5, %p175_p12  ;;  %s1116_s24 = smov [#allocation2]  }
  0x36   : > { %s1285_s25 = sshll.u32 %s1116_s24, 4  ;;  %s935_s29 = scalar_lea.hbm %s1249_s12, 512  ;;  %s189_s25 = int_to_ptr.vmem [resolvable:$true] %s1285_s25 }
  0x37   : > { %s1509_s8 = scalar_select %p1281_p13, 1, 0 }
  0x38   : > { %p936_p0 = scmp.ne.s32.totalorder %s1249_s12, %s935_s29  ;;  %s940_s13 = scalar_lea.hbm %s1497_s2, 1024 }
  0x39   : > { %p941_p4 = scmp.lt.u32.totalorder %s1249_s12, %s1497_s2  ;;  %p942_p5 = scmp.lt.u32.totalorder %s940_s13, %s935_s29 }
  0x3a   : > { %p938_p3 = pnand %p936_p0, %p907_p9  ;;  %p944_p11 = scmp.lt.u32.totalorder %s935_s29, %s1249_s12 }
  0x3b   : > { %p943_p12 = por %p942_p5, %p941_p4 }
  0x3c   : > { %p939_p2 = pneg %p938_p3 }
  0x3d   : > { %p945_p10 = por %p944_p11, %p943_p12 }
  0x3f   : > { %p946_p8 = pnand %p945_p10, %p939_p2 }
  0x41   : > { %949 = shalt.err (!%p946_p8)
}
  0x42   : > { %s950_s24 = scalar_lea.vmem %s1279_s14, 512  ;;  %s1117_s10 = smov [#allocation7]  }
  0x43   : > { %p951_p0 = scmp.ne.s32.totalorder %s1279_s14, %s950_s24  ;;  %s955_s11 = sshll.u32 %s1117_s10, 4  ;;  %s956_s11 = int_to_ptr.vmem [resolvable:$false] %s955_s11 }
  0x44   : > { %s957_s30 = scalar_lea.vmem %s956_s11, 1024  ;;  %p958_p6 = scmp.lt.s32.totalorder %s1279_s14, %s956_s11 }
  0x45   : > { %p953_p3 = pnand %p951_p0, %p907_p9  ;;  %p959_p4 = scmp.lt.s32.totalorder %s957_s30, %s950_s24 }
  0x47   : > { %p954_p1 = pneg %p953_p3  ;;  %p960_p5 = por %p959_p4, %p958_p6 }
  0x49   : > { %p961_p11 = pnand %p960_p5, %p954_p1 }
  0x4b   : > { %964 = shalt.err (!%p961_p11)
}
  0x4c   : > { %s1510_s29 = smov 128   ;;  %p1511_p9 = scmp.eq.s32.totalorder %s1253_s22, 0 }
  0x4d   : > { %838 = dma.hbm_to_vmem [thread:$0]  (!%p1206_p7), %s1249_s12, 512, %s1279_s14, %s1213_s9, %s1510_s29, %s1510_s29, %s1115_s7  }
  0x4e   : > { %p1512_p8 = pneg %p1281_p13  ;;  %s965_s24 = scalar_lea.hbm %s1495_s0, 128 }
  0x4f   : > { %p966_p6 = scmp.ne.s32.totalorder %s1495_s0, %s965_s24  ;;  %p972_p12 = scmp.lt.u32.totalorder %s965_s24, %s1495_s0 }
  0x50   : > { %p1322_p10 = pnand %p1512_p8, %p1511_p9 }
  0x52   : > { %p967_p1 = pneg %p1322_p10 }
  0x54   : > { %p968_p7 = pnand %p967_p1, %p966_p6 }
  0x56   : > { %p969_p2 = pneg %p968_p7 }
  0x58   : > { %p974_p0 = pnand %p972_p12, %p969_p2 }
  0x5a   : > { %977 = shalt.err (!%p974_p0)
}
  0x5b   : > { %s978_s12 = scalar_lea.vmem %s189_s25, 128  ;;  %p986_p11 = scmp.lt.s32.totalorder %s189_s25, %s189_s25 }
  0x5c   : > { %p979_p3 = scmp.ne.s32.totalorder %s189_s25, %s978_s12  ;;  %p987_p9 = scmp.lt.s32.totalorder %s978_s12, %s978_s12 }
  0x5e   : > { %p981_p4 = pnand %p979_p3, %p967_p1  ;;  %p988_p8 = por %p987_p9, %p986_p11 }
  0x60   : > { %p982_p5 = pneg %p981_p4 }
  0x62   : > { %p989_p13 = pnand %p988_p8, %p982_p5 }
  0x64   : > { %992 = shalt.err (!%p989_p13)
}
  0x65   : > { %831 = dma.hbm_to_vmem [thread:$0]  (!%p1322_p10), %s1495_s0, 128, %s189_s25, [#allocation3]  }
  0x66   : > { %p1514_p6 = scmp.ne.s32.totalorder %s1509_s8, 0 }
  0x67   : > { %p1515_p7 = scmp.eq.s32.totalorder (!%p1514_p6), %s1253_s22, 0 }
  0x68   : > { %245 = sbr.rel (%p1514_p6) target bundleno = 528 (0x210), region = 32 }
  0x6f   : > { %1074 = dma.done.wait (%p1515_p7), [#allocation3], 128   ;;  %p1516_p1 = pmov %p1515_p7 }
  0x70   : > { %s251_s29 = sand.u32 1, %s1253_s22   ;;  %s1350_s23 = sand.u32 1, %s1095_s16  }
  0x71   : > { %1076 = vsyncadd (%p1516_p1), [#allocation3], 4294967168  ;;  %s1353_s13 = sshll.u32 %s1350_s23, 5  ;;  %s252_s25 = scalar_lea.sflag [#allocation6], %s251_s29 }
  0x72   : > { %s255_s6 = scalar_lea.vmem [#allocation5], %s1353_s13  ;;  %p1517_p13 = scmp.ne.s32.totalorder %s1506_s26, 0 }
  0x74   : > { %1078 = dma.done.wait (%p1517_p13), %s252_s25, 1024  }
  0x75   : > { %1080 = vsyncadd (%p1517_p13), %s252_s25, 4294966272  ;;  %vm304_vm0 = vcmask 64512   ;;  %v299_v0 = vld [vmem:[#allocation2] sm:$0xff]  ;;  %s264_s8 = scalar_lea.vmem [#allocation7], %s1353_s13  ;;  %v300_v4 = vld [vmem:[%s255_s6] sm:$0xff]  ;;  %s291_s22 = scalar_lea.vmem [#allocation8], %s1353_s13 }
  0x76   : > { %v410_v1 = vld [vmem:[%s264_s8] sm:$0xff]  ;;  %v411_v2 = vld [vmem:[%s264_s8 + $0x8] sm:$0xff]  ;;  %804 = vmatprep.subr.mxu1 %v299_v0  ;;  %v412_v3 = vld [vmem:[%s264_s8 + $0x10] sm:$0xff]  ;;  %796 = vmatprep.subr.mxu0 %v299_v0  ;;  %s579_s26 = sshll.u32 %s291_s22, 4  ;;  %s784_s24 = sshll.u32 %s1103_s18, 9  ;;  %s1391_s26 = int_to_ptr.vmem [resolvable:$true] %s579_s26 }
  0x77   : > { %806 = vmatprep.mubr.msk.f32.mxu1 %vm304_vm0, %v410_v1  ;;  %805 = vmatpush3.msra.mxu1 %v299_v0  ;;  %v301_v5 = vld [vmem:[%s255_s6 + $0x8] sm:$0xff]  ;;  %v302_v6 = vld [vmem:[%s255_s6 + $0x10] sm:$0xff]  ;;  %v413_v7 = vld [vmem:[%s264_s8 + $0x18] sm:$0xff]  ;;  %s1398_s9 = scalar_lea.hbm %s1498_s3, %s784_s24  ;;  %s560_s7 = scalar_lea.sflag [#allocation4], %s1350_s23 }
  0x78   : > { %807 = vmatmul.mubr.msk.f32.vlgmr.msra.gmra.mrb[0].mxu1 %vm304_vm0, %v411_v2  ;;  %797 = vmatpush3.msra.mxu0 %v299_v0  ;;  %v303_v8 = vld [vmem:[%s255_s6 + $0x18] sm:$0xff]  ;;  %s993_s12 = scalar_lea.vmem %s1391_s26, 512  ;;  %p1518_p2 = scmp.ne.s32.totalorder %s1507_s28, 0 }
  0x79   : > { %809 = vmatprep.mubr.msk.f32.mxu1 %vm304_vm0, %v412_v3  ;;  %798 = vmatprep.mubr.msk.f32.mxu0 %vm304_vm0, %v300_v4  ;;  %p994_p10 = scmp.ne.s32.totalorder %s1391_s26, %s993_s12  ;;  %s1118_s14 = smov [#allocation8]  }
  0x7a   : > { %799 = vmatmul.mubr.msk.f32.vlgmr.msra.gmra.mrb[0].mxu0 %vm304_vm0, %v301_v5  ;;  %s997_s30 = sshll.u32 %s1118_s14, 4  ;;  %s998_s30 = int_to_ptr.vmem [resolvable:$false] %s997_s30 }
  0x7b   : > { %801 = vmatprep.mubr.msk.f32.mxu0 %vm304_vm0, %v302_v6  ;;  %p995_p12 = pnand %p994_p10, %p1518_p2  ;;  %s999_s29 = scalar_lea.vmem %s998_s30, 1024 }
  0x7c   : > { %810 = vmatmul.mubr.msk.f32.gmra.mrb[2].mxu1 %vm304_vm0, %v413_v7  ;;  %p1000_p3 = scmp.lt.s32.totalorder %s1391_s26, %s998_s30  ;;  %p1001_p4 = scmp.lt.s32.totalorder %s999_s29, %s993_s12 }
  0x7d   : > { %p996_p0 = pneg %p995_p12 }
  0x7e   : > { %802 = vmatmul.mubr.msk.f32.gmra.mrb[2].mxu0 %vm304_vm0, %v303_v8  ;;  %p1002_p5 = por %p1001_p4, %p1000_p3 }
  0x80   : > { %p1003_p11 = pnand %p1002_p5, %p996_p0 }
 0x14b   : > { %v1369_v9 = vpop.f32.mrb[0].mxu1 }
 0x14c   : > { %v1371_v10 = vpop.f32.mrb[1].mxu1  ;;  %v512_v12 = vand.u32 2147483647, %v1369_v9 }
 0x14d   : > { %v511_v11 = vand.u32 2147483647, %v1371_v10  ;;  %v800_v21 = vpop.f32.mrb[0].mxu0 }
 0x14e   : > { %v518_v18 = vsel %vm304_vm0, %v512_v12, -inf  ;;  %v383_v22 = vpop.f32.mrb[1].mxu0  ;;  %v403_v23 = vmul.f32 0.35355338, %v800_v21 }
 0x14f   : > { %v1375_v13 = vpop.f32.mrb[2].mxu1  ;;  %v515_v14 = vsel %vm304_vm0, %v511_v11, -inf  ;;  %v402_v24 = vmul.f32 0.35355338, %v383_v22 }
 0x150   : > { %516 = vmax.xlane.f32.xlu0 %v515_v14  ;;  %v1378_v15 = vpop.f32.mrb[3].mxu1  ;;  %v514_v17 = vand.u32 2147483647, %v1375_v13  ;;  %407 = vst.msk [vmem:[%s291_s22 + $0x8] sm:$0xff] %vm304_vm0, %v403_v23 }
 0x151   : > { %v513_v16 = vand.u32 2147483647, %v1378_v15  ;;  %406 = vst.msk [vmem:[%s291_s22] sm:$0xff] %vm304_vm0, %v402_v24  ;;  %v803_v25 = vpop.f32.mrb[2].mxu0 }
 0x152   : > { %v524_v20 = vsel %vm304_vm0, %v514_v17, -inf  ;;  %v393_v26 = vpop.f32.mrb[3].mxu0  ;;  %v405_v27 = vmul.f32 0.35355338, %v803_v25 }
 0x153   : > { %v521_v19 = vsel %vm304_vm0, %v513_v16, -inf  ;;  %v404_v28 = vmul.f32 0.35355338, %v393_v26 }
 0x154   : > { %519 = vmax.xlane.f32.xlu0 %v518_v18  ;;  %522 = vmax.xlane.f32.xlu1 %v521_v19  ;;  %409 = vst.msk [vmem:[%s291_s22 + $0x18] sm:$0xff] %vm304_vm0, %v405_v27 }
 0x155   : > { %408 = vst.msk [vmem:[%s291_s22 + $0x10] sm:$0xff] %vm304_vm0, %v404_v28 }
 0x158   : > { %525 = vmax.xlane.f32.xlu1 %v524_v20 }
 0x159   : > { %1006 = shalt.err (!%p1003_p11)
}
 0x15a   : > { %s1007_s25 = scalar_lea.hbm %s1398_s9, 512  ;;  %s1011_s22 = scalar_lea.hbm %s1498_s3, 1024 }
 0x15b   : > { %p1008_p9 = scmp.ne.s32.totalorder %s1398_s9, %s1007_s25  ;;  %p1012_p7 = scmp.lt.u32.totalorder %s1398_s9, %s1498_s3 }
 0x15c   : > { %p1013_p1 = scmp.lt.u32.totalorder %s1011_s22, %s1007_s25  ;;  %p1015_p10 = scmp.lt.u32.totalorder %s1007_s25, %s1398_s9 }
 0x15d   : > { %p1009_p8 = pnand %p1008_p9, %p1518_p2 }
 0x15e   : > { %p1014_p13 = por %p1013_p1, %p1012_p7 }
 0x15f   : > { %p1010_p6 = pneg %p1009_p8 }
 0x160   : > { %p1016_p12 = por %p1015_p10, %p1014_p13 }
 0x162   : > { %p1017_p0 = pnand %p1016_p12, %p1010_p6 }
 0x164   : > { %1020 = shalt.err (!%p1017_p0)
}
 0x165   : > { %s1119_s12 = smov 128   ;;  %s1120_s14 = smov 8  }
 0x166   : > { %824 = dma.vmem_to_hbm [thread:$0]  (%p1518_p2), %s1391_s26, 512, %s1398_s9, %s560_s7, %s1119_s12, %s1119_s12, %s1120_s14  }
 0x167   : > { %s298_s26 = scalar_lea.vmem [#allocation9], %s1353_s13  ;;  %s1437_s29 = scalar_lea.hbm %s1499_s4, %s784_s24 }
 0x168   : > { %s596_s9 = sshll.u32 %s298_s26, 4  ;;  %s565_s13 = scalar_lea.sflag [#allocation10], %s1350_s23  ;;  %s1439_s9 = int_to_ptr.vmem [resolvable:$true] %s596_s9 }
 0x169   : > { %s1021_s18 = scalar_lea.vmem %s1439_s9, 512  ;;  %s1121_s24 = smov [#allocation9]  }
 0x16a   : > { %p1022_p3 = scmp.ne.s32.totalorder %s1439_s9, %s1021_s18  ;;  %s1025_s25 = sshll.u32 %s1121_s24, 4  ;;  %s1026_s25 = int_to_ptr.vmem [resolvable:$false] %s1025_s25 }
 0x16b   : > { %s1027_s6 = scalar_lea.vmem %s1026_s25, 1024  ;;  %p1028_p11 = scmp.lt.s32.totalorder %s1439_s9, %s1026_s25 }
 0x16c   : > { %p1023_p4 = pnand %p1022_p3, %p1518_p2  ;;  %p1029_p9 = scmp.lt.s32.totalorder %s1027_s6, %s1021_s18 }
 0x16e   : > { %p1024_p5 = pneg %p1023_p4  ;;  %p1030_p8 = por %p1029_p9, %p1028_p11 }
 0x170   : > { %p1031_p6 = pnand %p1030_p8, %p1024_p5 }
 0x1dd   : > { %v517_v29 = vpop.xlane.xlu0 %516 }
 0x1e1   : > { %v520_v30 = vpop.xlane.xlu0 %519  ;;  %v523_v31 = vpop.xlane.xlu1 %522 }
 0x1e2   : > { %v527_v32 = vmax.f32 %v517_v29, %v520_v30 }
 0x1e4   : > { %v528_v33 = vmax.f32 %v527_v32, %v523_v31 }
 0x1e5   : > { %v526_v34 = vpop.xlane.xlu1 %525 }
 0x1e6   : > { %v529_v35 = vmax.f32 %v528_v33, %v526_v34 }
 0x1e8   : > { %vm530_vm1 = vcmp.eq.f32.partialorder %v529_v35, 0.0 }
 0x1e9   : > { %v531_v36 = vsel %vm530_vm1, 1.0, %v529_v35 }
 0x1ea   : > { %v532_v37 = vmul.f32 0.007874016, %v531_v36 }
 0x1ec   : > { %903 = vrcp.f32 %v532_v37  ;;  %v534_v51 = vmul.f32 0.35355338, %v532_v37 }
 0x1f6   : > { %v904_v38 = vpop.eup %903 }
 0x1f7   : > { %v535_v39 = vmul.f32 %v904_v38, %v1371_v10  ;;  %v536_v40 = vmul.f32 %v904_v38, %v1369_v9  ;;  %v537_v41 = vmul.f32 %v904_v38, %v1378_v15  ;;  %v538_v42 = vmul.f32 %v904_v38, %v1375_v13 }
 0x1f9   : > { %v812_v43 = vround.rtne.f32 %v535_v39  ;;  %v813_v44 = vround.rtne.f32 %v536_v40  ;;  %v814_v45 = vround.rtne.f32 %v537_v41  ;;  %v815_v46 = vround.rtne.f32 %v538_v42 }
 0x1fb   : > { %v543_v47 = vmax.f32 %v812_v43, -128.0  ;;  %v544_v48 = vmax.f32 %v813_v44, -128.0  ;;  %v545_v49 = vmax.f32 %v814_v45, -128.0  ;;  %v546_v50 = vmax.f32 %v815_v46, -128.0 }
 0x1fd   : > { %v547_v52 = vmin.f32 %v543_v47, 127.0  ;;  %v548_v53 = vmin.f32 %v544_v48, 127.0  ;;  %v549_v54 = vmin.f32 %v545_v49, 127.0  ;;  %v550_v55 = vmin.f32 %v546_v50, 127.0 }
 0x1ff   : > { %v551_v56 = vmul.f32 %v547_v52, %v534_v51  ;;  %v552_v57 = vmul.f32 %v548_v53, %v534_v51  ;;  %v553_v58 = vmul.f32 %v549_v54, %v534_v51  ;;  %v554_v59 = vmul.f32 %v550_v55, %v534_v51 }
 0x201   : > { %555 = vst.msk [vmem:[%s298_s26] sm:$0xff] %vm304_vm0, %v551_v56  ;;  %556 = vst.msk [vmem:[%s298_s26 + $0x8] sm:$0xff] %vm304_vm0, %v552_v57 }
 0x202   : > { %557 = vst.msk [vmem:[%s298_s26 + $0x10] sm:$0xff] %vm304_vm0, %v553_v58  ;;  %558 = vst.msk [vmem:[%s298_s26 + $0x18] sm:$0xff] %vm304_vm0, %v554_v59 }
 0x203   : > { %1034 = shalt.err (!%p1031_p6)
}
 0x204   : > { %s1035_s8 = scalar_lea.hbm %s1437_s29, 512  ;;  %s1039_s11 = scalar_lea.hbm %s1499_s4, 1024 }
 0x205   : > { %p1036_p7 = scmp.ne.s32.totalorder %s1437_s29, %s1035_s8  ;;  %p1040_p10 = scmp.lt.u32.totalorder %s1437_s29, %s1499_s4 }
 0x206   : > { %p1041_p12 = scmp.lt.u32.totalorder %s1039_s11, %s1035_s8  ;;  %p1043_p3 = scmp.lt.u32.totalorder %s1035_s8, %s1437_s29 }
 0x207   : > { %p1037_p1 = pnand %p1036_p7, %p1518_p2 }
 0x208   : > { %p1042_p0 = por %p1041_p12, %p1040_p10 }
 0x209   : > { %p1038_p13 = pneg %p1037_p1 }
 0x20a   : > { %p1044_p4 = por %p1043_p3, %p1042_p0 }
 0x20c   : > { %p1045_p5 = pnand %p1044_p4, %p1038_p13 }
 0x20e   : > { %1048 = shalt.err (!%p1045_p5)
}
 0x20f   : > { %825 = dma.vmem_to_hbm [thread:$0]  (%p1518_p2), %s1439_s9, 512, %s1437_s29, %s565_s13, %s1119_s12, %s1119_s12, %s1120_s14  }
 0x210 PF: > { %s611_s30 = sand.u32 1, %s1091_s15   ;;  %p1519_p11 = scmp.ne.s32.totalorder %s1508_s5, 0 }
 0x211   : > { %p1520_p9 = scmp.ge.s32.totalorder %s1111_s20, 2  ;;  %s612_s18 = scalar_lea.sflag [#allocation4], %s611_s30 }
 0x213   : > { %p840_p8 = pnand %p1520_p9, %p1519_p11 }
 0x215   : > { %1082 = dma.done.wait (!%p840_p8), %s612_s18, 512  }
 0x216   : > { %1084 = vsyncadd (!%p840_p8), %s612_s18, 4294966784  ;;  %s621_s28 = scalar_lea.sflag [#allocation10], %s611_s30 }
 0x217   : > { %1086 = dma.done.wait (!%p840_p8), %s621_s28, 512  }
 0x218   : > { %1088 = vsyncadd (!%p840_p8), %s621_s28, 4294966784  ;;  %s25_s20 = sadd.s32 1, %s1111_s20   ;;  %s1521_s15 = smov %s1095_s16 }
 0x219   : > { %p22_p6 = scmp.ge.s32.totalorder %s25_s20, 4   ;;  %s1522_s16 = smov %s1099_s17 }
 0x21a   : > { %s1523_s17 = smov %s1195_s27  ;;  %s1524_s18 = smov %s1107_s19 }
 0x21b   : > { %s1525_s19 = smov %s1527_s21  ;;  %24 = sbr.rel (!%p22_p6) target bundleno = 9 (0x9), region = 110 }
 0x222   :  { %626 = vsyncpa [#allocation3], 1 }
 0x223   :  { %628 = vsyncpa [#allocation3 + $0x1], 1 }
 0x224   :  { %629 = vsyncpa [#allocation6], 1 }
 0x225   :  { %631 = vsyncpa [#allocation6 + $0x1], 1 }
 0x226   :  { %632 = vsyncpa [#allocation4], 1 }
 0x227   :  { %634 = vsyncpa [#allocation4 + $0x1], 1 }
 0x228   :  { %635 = vsyncpa [#allocation10], 1 }
 0x229   :  { %637 = vsyncpa [#allocation10 + $0x1], 1 }

</bundles_post_ra>
